<compile_context>
chip_gen: v6e
topology: v6e:2x2x1
jax: 0.10.0
libtpu: 0.0.40
codegen_flags: <defaults>
</compile_context>

<pallas_src>
import functools

import jax
import jax.numpy as jnp
from jax.experimental import pallas as pl
from jax.experimental.pallas import tpu as pltpu


# Below v7x's 64 MiB physical VMEM (headroom for pipeline buffers / internal
# scratch); comfortably legal on v5e/v6e (128 MiB physical).
DEFAULT_VMEM_LIMIT = 48 * 1024 * 1024


def _row_tile(n, target, align=8):
    """Largest multiple of `align` <= target that divides n, capped at n//2 when
    possible so the 'parallel' row axis has >= 2 tiles (v7x megacore)."""
    assert n % align == 0
    cap = min(target, n)
    if n >= 2 * align:
        cap = min(cap, (n // 2) // align * align)
    t = max(align, cap - cap % align)
    while n % t:
        t -= align
    return t


def _lane_tile(n, target):
    """Neighbour-chunk size (lane dim): a multiple of 128 dividing n, else full n."""
    if n < 256 or n % 128:
        return n
    t = min(target, n)
    t -= t % 128
    while n % t:
        t -= 128
    return t


def _sage_layer_kernel(adj_ref, inv_ref, x_ref, wl_ref, wr_ref, b_ref,
                       o_ref, acc_ref, *, tm, nk, apply_relu):
    """Fused SAGEConv layer for one (row tile, neighbour chunk) grid point.

    adj_ref: (tm, nk)  binary adjacency tile (int8 or bf16, values 0/1)
    inv_ref: (tm, 1)   per-destination-row 1/deg (f32)
    x_ref  : (N, F)    node features, VMEM-resident (bf16)
    wl_ref : (F, H)    neighbour weight (bf16)
    wr_ref : (F, H)    root/skip weight (bf16)
    b_ref  : (1, H)    bias (f32)
    o_ref  : (tm, H)   output rows
    acc_ref: (tm, H)   f32 accumulator (persists across the k axis)
    """
    i = pl.program_id(0)
    k = pl.program_id(1)

    @pl.when(k == 0)
    def _init():
        acc_ref[...] = jnp.zeros_like(acc_ref)

    # Transform this neighbour chunk on the fly: (nk, F) @ (F, H) -> (nk, H).
    xk = x_ref[pl.ds(pl.multiple_of(k * nk, nk), nk), :]
    h_l = jnp.dot(xk, wl_ref[...],
                  preferred_element_type=jnp.float32).astype(wl_ref.dtype)

    # Binary adjacency -> bf16 (exact for 0/1), MXU dot with f32 accumulation.
    adj = adj_ref[...].astype(wl_ref.dtype)
    acc_ref[...] += jnp.dot(adj, h_l, preferred_element_type=jnp.float32)

    @pl.when(k == pl.num_programs(1) - 1)
    def _finalize():
        # Skip / root term, computed once per row tile: x[rows] @ W_r + b.
        xr = x_ref[pl.ds(pl.multiple_of(i * tm, tm), tm), :]
        skip = jnp.dot(xr, wr_ref[...],
                       preferred_element_type=jnp.float32) + b_ref[...]
        out = acc_ref[...] * inv_ref[...] + skip       # mean-normalize the agg term
        if apply_relu:
            out = jnp.maximum(out, 0.0)
        o_ref[...] = out.astype(o_ref.dtype)


def sage_conv(x, adj_bin, inv_deg, wl, wr, b, *, apply_relu, out_dtype,
              compute_dtype=jnp.bfloat16, tm=512, nk=2048,
              vmem_limit_bytes=DEFAULT_VMEM_LIMIT):
    """One SAGEConv layer: out = inv_deg * (adj_bin @ (x @ wl)) + x @ wr + b
    (+ optional ReLU).  Identical to (A_mean @ x) @ wl + x @ wr + b up to f32
    reassociation."""
    N, F = x.shape
    H = wl.shape[1]
    assert adj_bin.shape == (N, N) and inv_deg.shape == (N, 1)
    assert N % 8 == 0

    align = 32 if adj_bin.dtype == jnp.int8 else 8
    tm_ = _row_tile(N, tm, align)
    nk_ = _lane_tile(N, nk)

    xc = x if x.dtype == compute_dtype else x.astype(compute_dtype)
    wlc = wl.astype(compute_dtype)
    wrc = wr.astype(compute_dtype)
    b2 = b.reshape(1, H).astype(jnp.float32)

    # TODO(synk): for very large N*F (x no longer fits VMEM) switch x to a streamed
    # per-chunk (nk, F) BlockSpec instead of full residency.

    kernel = functools.partial(_sage_layer_kernel, tm=tm_, nk=nk_,
                               apply_relu=apply_relu)
    return pl.pallas_call(
        kernel,
        out_shape=jax.ShapeDtypeStruct((N, H), out_dtype),
        grid_spec=pltpu.PrefetchScalarGridSpec(
            num_scalar_prefetch=0,
            grid=(N // tm_, N // nk_),
            in_specs=[
                pl.BlockSpec((tm_, nk_), lambda i, k: (i, k)),   # binary adjacency
                pl.BlockSpec((tm_, 1), lambda i, k: (i, 0)),     # 1/deg per row
                pl.BlockSpec((N, F), lambda i, k: (0, 0)),       # x (VMEM-resident)
                pl.BlockSpec((F, H), lambda i, k: (0, 0)),       # W_l
                pl.BlockSpec((F, H), lambda i, k: (0, 0)),       # W_r
                pl.BlockSpec((1, H), lambda i, k: (0, 0)),       # bias
            ],
            out_specs=pl.BlockSpec((tm_, H), lambda i, k: (i, 0)),
            scratch_shapes=[pltpu.VMEM((tm_, H), jnp.float32)]),
        compiler_params=pltpu.CompilerParams(
            dimension_semantics=("parallel", "arbitrary"),
            vmem_limit_bytes=vmem_limit_bytes),
    )(adj_bin, inv_deg, xc, wlc, wrc, b2)


def sage_forward(x, adj_norm, params, *, compute_dtype=jnp.bfloat16,
                 out_dtype=jnp.float32):
    """Full SAGE model: ReLU after every layer except the last.

    adj_norm is the row-normalized (mean) dense adjacency; it is factored once
    (outside the layer loop) into a binary adjacency (narrow storage) and a
    per-row 1/deg scale."""
    # TODO(synk): F.dropout(training=True) not implemented; model runs in eval mode.
    N = adj_norm.shape[0]
    inv_deg = jnp.max(adj_norm, axis=1, keepdims=True).astype(jnp.float32)  # 1/deg (0 if no nbrs)
    adj_store_dtype = jnp.int8 if N % 32 == 0 else compute_dtype            # int8 halves HBM bytes
    adj_bin = (adj_norm > 0).astype(adj_store_dtype)

    h = x.astype(compute_dtype)
    n_layers = len(params)
    for li, (wl, wr, b) in enumerate(params):
        last = li == n_layers - 1
        h = sage_conv(h, adj_bin, inv_deg, wl, wr, b,
                      apply_relu=not last,
                      out_dtype=out_dtype if last else compute_dtype,
                      compute_dtype=compute_dtype)
    return h


def init_params(key, in_channels, hidden_channels, out_channels, num_layers):
    """Deterministic glorot-ish init matching SAGEConv parameter shapes."""
    dims = ([in_channels] + [hidden_channels] * (num_layers - 1)
            + [out_channels])
    params = []
    for li in range(num_layers):
        f_in, f_out = dims[li], dims[li + 1]
        key, k1, k2 = jax.random.split(key, 3)
        scale = (6.0 / (f_in + f_out)) ** 0.5
        wl = jax.random.uniform(k1, (f_in, f_out), jnp.float32, -scale, scale)
        wr = jax.random.uniform(k2, (f_in, f_out), jnp.float32, -scale, scale)
        b = jnp.zeros((1, f_out), jnp.float32)
        params.append((wl, wr, b))
    return params


def make_adj(key, n_nodes, p=0.15):
    """Random binary adjacency, row-normalized for mean aggregation."""
    a = (jax.random.uniform(key, (n_nodes, n_nodes)) < p).astype(jnp.float32)
    a = a * (1.0 - jnp.eye(n_nodes, dtype=jnp.float32))   # no self-loops
    deg = a.sum(axis=1, keepdims=True)
    return jnp.where(deg > 0, a / jnp.maximum(deg, 1.0), 0.0)


def reference_forward(x, adj_norm, params, *, compute_dtype=jnp.bfloat16):
    """Pure-JAX reference with the original (adj @ x) @ W_l association, f32 math,
    on the same bf16-rounded operands / activation storage the kernel uses."""
    f32 = jnp.float32
    adj = adj_norm.astype(f32)
    h = x.astype(compute_dtype).astype(f32)
    n_layers = len(params)
    for li, (wl, wr, b) in enumerate(params):
        wl_c = wl.astype(compute_dtype).astype(f32)
        wr_c = wr.astype(compute_dtype).astype(f32)
        out = (adj @ h) @ wl_c + h @ wr_c + b.reshape(1, -1)
        if li != n_layers - 1:
            out = jnp.maximum(out, 0.0)
            out = out.astype(compute_dtype).astype(f32)   # activations stored in bf16
        h = out
    return h


if __name__ == "__main__":
    # small config: N=64 nodes, in=32, hidden=32, out=16, 3 layers
    N, IN_C, HID_C, OUT_C, NUM_LAYERS = 64, 32, 32, 16, 3

    key = jax.random.PRNGKey(0)
    k_x, k_adj, k_p = jax.random.split(key, 3)

    x = jax.random.normal(k_x, (N, IN_C), jnp.float32)
    adj_norm = make_adj(k_adj, N)
    params = init_params(k_p, IN_C, HID_C, OUT_C, NUM_LAYERS)

    out = sage_forward(x, adj_norm, params)
    out = jax.block_until_ready(out)

    ref = reference_forward(x, adj_norm, params)
    assert out.shape == (N, OUT_C)
    assert out.dtype == jnp.float32
    max_err = float(jnp.max(jnp.abs(out - ref)))
    assert jnp.allclose(out, ref, atol=2e-2, rtol=2e-2), f"max abs err {max_err}"

    print("KERNEL_OK")
</pallas_src>

<mosaic_0001>
module attributes {stable_mosaic.version = 11 : i64} {
  func.func @_sage_layer_kernel(%arg0: i32, %arg1: i32, %arg2: memref<32x64xi8, #tpu.memory_space<vmem>>, %arg3: memref<32x1xf32, #tpu.memory_space<vmem>>, %arg4: memref<64x32xbf16, #tpu.memory_space<vmem>>, %arg5: memref<32x32xbf16, #tpu.memory_space<vmem>>, %arg6: memref<32x32xbf16, #tpu.memory_space<vmem>>, %arg7: memref<1x32xf32, #tpu.memory_space<vmem>>, %arg8: memref<32x32xbf16, #tpu.memory_space<vmem>>, %arg9: memref<32x32xf32, #tpu.memory_space<vmem>>) attributes {dimension_semantics = [#tpu.dimension_semantics<parallel>, #tpu.dimension_semantics<arbitrary>], iteration_bounds = array<i64: 2, 1>, scalar_prefetch = 0 : i64, scratch_operands = 1 : i64, tpu.core_type = #tpu.core_type<tc>, window_params = [{transform_indices = @transform_0, window_bounds = array<i64: 32, 64>}, {transform_indices = @transform_1, window_bounds = array<i64: 32, 1>}, {pipeline_mode = #tpu.pipeline_mode<synchronous>, transform_indices = @transform_2, window_bounds = array<i64: 64, 32>}, {pipeline_mode = #tpu.pipeline_mode<synchronous>, transform_indices = @transform_3, window_bounds = array<i64: 32, 32>}, {pipeline_mode = #tpu.pipeline_mode<synchronous>, transform_indices = @transform_4, window_bounds = array<i64: 32, 32>}, {pipeline_mode = #tpu.pipeline_mode<synchronous>, transform_indices = @transform_5, window_bounds = array<i64: 1, 32>}, {transform_indices = @transform_6, window_bounds = array<i64: 32, 32>}]} {
    %c0_i32 = arith.constant 0 : i32
    %0 = arith.cmpi eq, %arg1, %c0_i32 : i32
    %1 = arith.extui %0 : i1 to i32
    %c0_i32_0 = arith.constant 0 : i32
    %2 = arith.cmpi ne, %1, %c0_i32_0 : i32
    scf.if %2 {
      %cst_12 = arith.constant 0.000000e+00 : f32
      %19 = vector.broadcast %cst_12 : f32 to vector<32x32xf32>
      %c0_13 = arith.constant 0 : index
      %c0_14 = arith.constant 0 : index
      %20 = vector.load %arg9[%c0_13, %c0_14] : memref<32x32xf32, #tpu.memory_space<vmem>>, vector<32x32xf32>
      tpu.vector_store %arg9[%c0_13, %c0_14], %19 {strides = array<i32>} : memref<32x32xf32, #tpu.memory_space<vmem>>, vector<32x32xf32>,
    } else {
    }
    %c64_i32 = arith.constant 64 : i32
    %3 = arith.muli %arg1, %c64_i32 : i32
    %4 = tpu.assume_multiple %3, 64 : i32
    %5 = arith.index_cast %4 : i32 to index
    %c0 = arith.constant 0 : index
    %6 = vector.load %arg4[%5, %c0] : memref<64x32xbf16, #tpu.memory_space<vmem>>, vector<64x32xbf16>
    %c0_1 = arith.constant 0 : index
    %c0_2 = arith.constant 0 : index
    %7 = vector.load %arg5[%c0_1, %c0_2] : memref<32x32xbf16, #tpu.memory_space<vmem>>, vector<32x32xbf16>
    %cst = arith.constant dense<0.000000e+00> : vector<64x32xf32>
    %8 = tpu.matmul %6, %7, %cst {dimension_numbers = #tpu.dot_dimension_numbers<[1], [0], [0], [1], [0, 0, 1, 1], [], []>} : vector<64x32xbf16>, vector<32x32xbf16>, vector<64x32xf32> -> vector<64x32xf32>
    %9 = arith.truncf %8 : vector<64x32xf32> to vector<64x32xbf16>
    %c0_3 = arith.constant 0 : index
    %c0_4 = arith.constant 0 : index
    %10 = vector.load %arg2[%c0_3, %c0_4] : memref<32x64xi8, #tpu.memory_space<vmem>>, vector<32x64xi8>
    %11 = arith.sitofp %10 : vector<32x64xi8> to vector<32x64xbf16>
    %c0_5 = arith.constant 0 : index
    %c0_6 = arith.constant 0 : index
    %12 = vector.load %arg9[%c0_5, %c0_6] : memref<32x32xf32, #tpu.memory_space<vmem>>, vector<32x32xf32>
    %cst_7 = arith.constant dense<0.000000e+00> : vector<32x32xf32>
    %13 = tpu.matmul %11, %9, %cst_7 {dimension_numbers = #tpu.dot_dimension_numbers<[1], [0], [0], [1], [0, 0, 1, 1], [], []>} : vector<32x64xbf16>, vector<64x32xbf16>, vector<32x32xf32> -> vector<32x32xf32>
    %14 = arith.addf %12, %13 : vector<32x32xf32>
    %c0_8 = arith.constant 0 : index
    %c0_9 = arith.constant 0 : index
    %15 = vector.load %arg9[%c0_8, %c0_9] : memref<32x32xf32, #tpu.memory_space<vmem>>, vector<32x32xf32>
    tpu.vector_store %arg9[%c0_8, %c0_9], %14 {strides = array<i32>} : memref<32x32xf32, #tpu.memory_space<vmem>>, vector<32x32xf32>,
    %c0_i32_10 = arith.constant 0 : i32
    %16 = arith.cmpi eq, %arg1, %c0_i32_10 : i32
    %17 = arith.extui %16 : i1 to i32
    %c0_i32_11 = arith.constant 0 : i32
    %18 = arith.cmpi ne, %17, %c0_i32_11 : i32
    scf.if %18 {
      %c32_i32 = arith.constant 32 : i32
      %19 = arith.muli %arg0, %c32_i32 : i32
      %20 = tpu.assume_multiple %19, 32 : i32
      %21 = arith.index_cast %20 : i32 to index
      %c0_12 = arith.constant 0 : index
      %22 = vector.load %arg4[%21, %c0_12] : memref<64x32xbf16, #tpu.memory_space<vmem>>, vector<32x32xbf16>
      %c0_13 = arith.constant 0 : index
      %c0_14 = arith.constant 0 : index
      %23 = vector.load %arg6[%c0_13, %c0_14] : memref<32x32xbf16, #tpu.memory_space<vmem>>, vector<32x32xbf16>
      %cst_15 = arith.constant dense<0.000000e+00> : vector<32x32xf32>
      %24 = tpu.matmul %22, %23, %cst_15 {dimension_numbers = #tpu.dot_dimension_numbers<[1], [0], [0], [1], [0, 0, 1, 1], [], []>} : vector<32x32xbf16>, vector<32x32xbf16>, vector<32x32xf32> -> vector<32x32xf32>
      %c0_16 = arith.constant 0 : index
      %c0_17 = arith.constant 0 : index
      %25 = vector.load %arg7[%c0_16, %c0_17] : memref<1x32xf32, #tpu.memory_space<vmem>>, vector<1x32xf32>
      %26 = vector.broadcast %25 : vector<1x32xf32> to vector<32x32xf32>
      %27 = arith.addf %24, %26 : vector<32x32xf32>
      %c0_18 = arith.constant 0 : index
      %c0_19 = arith.constant 0 : index
      %28 = vector.load %arg9[%c0_18, %c0_19] : memref<32x32xf32, #tpu.memory_space<vmem>>, vector<32x32xf32>
      %c0_20 = arith.constant 0 : index
      %c0_21 = arith.constant 0 : index
      %29 = vector.load %arg3[%c0_20, %c0_21] : memref<32x1xf32, #tpu.memory_space<vmem>>, vector<32x1xf32>
      %30 = vector.broadcast %29 : vector<32x1xf32> to vector<32x32xf32>
      %31 = arith.mulf %28, %30 : vector<32x32xf32>
      %32 = arith.addf %31, %27 : vector<32x32xf32>
      %cst_22 = arith.constant 0.000000e+00 : f32
      %33 = vector.broadcast %cst_22 : f32 to vector<32x32xf32>
      %34 = arith.maximumf %32, %33 : vector<32x32xf32>
      %35 = arith.truncf %34 : vector<32x32xf32> to vector<32x32xbf16>
      %c0_23 = arith.constant 0 : index
      %c0_24 = arith.constant 0 : index
      %36 = vector.load %arg8[%c0_23, %c0_24] : memref<32x32xbf16, #tpu.memory_space<vmem>>, vector<32x32xbf16>
      tpu.vector_store %arg8[%c0_23, %c0_24], %35 {strides = array<i32>} : memref<32x32xbf16, #tpu.memory_space<vmem>>, vector<32x32xbf16>,
    } else {
    }
    return
  }
  func.func @transform_0(%arg0: i32, %arg1: i32) -> (i32, i32) {
    %c0_i32 = arith.constant 0 : i32
    return %arg0, %arg1 : i32, i32
  }
  func.func @transform_1(%arg0: i32, %arg1: i32) -> (i32, i32) {
    %c0_i32 = arith.constant 0 : i32
    %c0_i32_0 = arith.constant 0 : i32
    return %arg0, %c0_i32 : i32, i32
  }
  func.func @transform_2(%arg0: i32, %arg1: i32) -> (i32, i32) {
    %c0_i32 = arith.constant 0 : i32
    %c0_i32_0 = arith.constant 0 : i32
    %c0_i32_1 = arith.constant 0 : i32
    return %c0_i32, %c0_i32_0 : i32, i32
  }
  func.func @transform_3(%arg0: i32, %arg1: i32) -> (i32, i32) {
    %c0_i32 = arith.constant 0 : i32
    %c0_i32_0 = arith.constant 0 : i32
    %c0_i32_1 = arith.constant 0 : i32
    return %c0_i32, %c0_i32_0 : i32, i32
  }
  func.func @transform_4(%arg0: i32, %arg1: i32) -> (i32, i32) {
    %c0_i32 = arith.constant 0 : i32
    %c0_i32_0 = arith.constant 0 : i32
    %c0_i32_1 = arith.constant 0 : i32
    return %c0_i32, %c0_i32_0 : i32, i32
  }
  func.func @transform_5(%arg0: i32, %arg1: i32) -> (i32, i32) {
    %c0_i32 = arith.constant 0 : i32
    %c0_i32_0 = arith.constant 0 : i32
    %c0_i32_1 = arith.constant 0 : i32
    return %c0_i32, %c0_i32_0 : i32, i32
  }
  func.func @transform_6(%arg0: i32, %arg1: i32) -> (i32, i32) {
    %c0_i32 = arith.constant 0 : i32
    %c0_i32_0 = arith.constant 0 : i32
    return %arg0, %c0_i32 : i32, i32
  }
}

</mosaic_0001>

<bundles_post_ra>
// kernel: tpu_custom_call.1
= control target key start
LH: loop header
LB: loop body
LE: loop exit
PB: predicated region body
PF: predicated region fallthrough
CT: control target
= control target key end

     0   :  { %s940_s21 = smov 0   ;;  %s942_s22 = smov 0   ;;  %s1032_s0 = inlined_call_operand.vmem [shape: s8[64,64], index: 0, kind: input, shape index: {}]   ;;  %s1033_s1 = inlined_call_operand.vmem [shape: f32[64,1], index: 1, kind: input, shape index: {}]   ;;  %s1034_s2 = inlined_call_operand.vmem [shape: bf16[64,32], index: 2, kind: input, shape index: {}]   ;;  %s1035_s3 = inlined_call_operand.vmem [shape: bf16[32,32], index: 3, kind: input, shape index: {}]   ;;  %s1036_s4 = inlined_call_operand.vmem [shape: bf16[32,32], index: 4, kind: input, shape index: {}]   ;;  %s1037_s5 = inlined_call_operand.vmem [shape: f32[1,32], index: 5, kind: input, shape index: {}]   ;;  %s1038_s6 = inlined_call_operand.vmem [shape: bf16[64,32], index: 6, kind: output, shape index: {}]  }
   0x1   :  { %s944_s23 = smov 0  }
   0x2 LB: > { %s28_s24 = sadd.s32 1, %s897_s22  ;;  %p756_p0 = scmp.ge.s32.totalorder %s901_s23, 1  ;;  %s901_s23 = sphi %s944_s23, %s16_s23   ;;  %s897_s22 = sphi %s942_s22, %s1040_s22   ;;  %s893_s21 = sphi %s940_s21, %s1039_s21  }
   0x3   : > { %p30_p1 = scmp.ge.s32.totalorder %s28_s24, 2  ;;  %p239_p2 = scmp.lt.s32.totalorder %s901_s23, 3 }
   0x5   : > { %s1042_s24 = smov (%p30_p1, %s28_s24), 0  ;;  %p240_p3 = pnand %p756_p0, %p239_p2 }
   0x6   : > { %p276_p4 = scmp.lt.s32.totalorder (!%p240_p3), %s893_s21, 1  ;;  %s774_s20 = sshll.u32 (!%p240_p3), %s893_s21, 5 }
   0x7   : > { %243 = sbr.rel (%p240_p3) target bundleno = 462 (0x1ce), region = 44  ;;  %s511_s27 = sshra.s32 (!%p240_p3), %s774_s20, 3 }
   0x8   : > { %s775_s28 = sshll.u32 (!%p240_p3), %s511_s27, 2  ;;  %s758_s8 = sshll.u32 (!%p240_p3), %s893_s21, 2 }
   0x9   : > { %s514_s7 = scalar_lea.vmem (!%p240_p3), %s1034_s2, %s775_s28  ;;  %p284_p5 = scmp.lt.s32.totalorder (!%p240_p3), %s758_s8, 7 }
   0xc   : > { %v869_v0 = vld [vmem:[%s1035_s3 + $0x8] sm:$0xff]   ;;  %v870_v1 = vld [vmem:[%s1035_s3] sm:$0xff]   ;;  %vm300_vm0 = vcmask 261120   ;;  %v873_v4 = vld [vmem:[%s1034_s2 + $0x10] sm:$0xff]   ;;  %s277_s13 = scalar_select %p276_p4, %s893_s21, 1  ;;  %vm443_vm1 = vcmask 523264  }
   0xd   : > { %809 = vmatprep.subr.bf16.mxu0 %v869_v0  ;;  %v871_v2 = vld [vmem:[%s1034_s2] sm:$0xff]   ;;  %v872_v3 = vld [vmem:[%s1034_s2 + $0x8] sm:$0xff]   ;;  %v874_v5 = vld [vmem:[%s1034_s2 + $0x18] sm:$0xff]   ;;  %v903_v10 = vmov 0   ;;  %v904_v11 = vmov 0.0   ;;  %s1044_s8 = smov (!%p284_p5, %s758_s8), 7 }
   0xe   : > { %810 = vmatpush3.bf16.msra.mxu0 %v869_v0  ;;  %813 = vmatprep.mubr.msk.bf16.mxu0 %vm300_vm0, %v871_v2  ;;  %v875_v6 = vld [vmem:[%s1036_s4 + $0x8] sm:$0xff]   ;;  %s757_s16 = sshll.u32 %s277_s13, 3  ;;  %v876_v9 = vld [vmem:[%s1036_s4] sm:$0xff]   ;;  %303 = vst.msk [vmem:[#allocation2 + $0x10] sm:$0xff] %vm300_vm0, %v904_v11  ;;  %301 = vst.msk [vmem:[#allocation2] sm:$0xff] %vm300_vm0, %v904_v11  ;;  %s759_s21 = sshll.u32 %s1044_s8, 3 }
   0xf   : > { %811 = vmatprep.subr.bf16.mxu0 %v870_v1  ;;  %s282_s19 = scalar_lea.vmem %s1032_s0, %s757_s16  ;;  %867 = vset.pattern.permute.xlu0 %v903_v10  ;;  %302 = vst.msk [vmem:[#allocation2 + $0x8] sm:$0xff] %vm300_vm0, %v904_v11  ;;  %304 = vst.msk [vmem:[#allocation2 + $0x18] sm:$0xff] %vm300_vm0, %v904_v11  ;;  %v877_v12 = vld [vmem:[%s514_s7] sm:$0xff]   ;;  %v878_v13 = vld [vmem:[%s514_s7 + $0x8] sm:$0xff]   ;;  %s287_s11 = scalar_lea.vmem %s1033_s1, %s759_s21  ;;  %vm663_vm2 = vcmask 257024  }
  0x10   : > { %v436_v7 = vld [vmem:[%s282_s19] sm:$0xff]  ;;  %868 = vset.pattern.permute.xlu1 %v903_v10  ;;  %v613_v15 = vld [vmem:[%s287_s11 + $0x10] sm:$0xff]  ;;  %v612_v16 = vld [vmem:[%s287_s11 + $0x8] sm:$0xff]  ;;  %s761_s14 = sshll.u32 %s1044_s8, 2 }
  0x11   : > { %v437_v8 = vunpack.c.l.s8.bf16 %v436_v7  ;;  %v611_v14 = vld [vmem:[%s287_s11] sm:$0xff]  ;;  %627 = vperm.xlu1 %868, %v613_v15   ;;  %v614_v17 = vld [vmem:[%s287_s11 + $0x18] sm:$0xff]  ;;  %v438_v30 = vunpack.c.h.s8.bf16 %v436_v7  ;;  %s293_s17 = scalar_lea.vmem %s1038_s6, %s761_s14 }
  0x12   : > { %812 = vmatpush3.bf16.msra.mxu0 %v870_v1  ;;  %617 = vperm.xlu0 %867, %v611_v14   ;;  %v776_v46 = vld [vmem:[%s1037_s5] ss:$0 sm:$0xff] }
  0x13   : > { %833 = vmatprep.subr.bf16.mxu0 %v875_v6  ;;  %829 = vmatprep.mubr.msk.bf16.mxu1 %vm443_vm1, %v437_v8 }
  0x15   : > { %814 = vmatmul.mubr.msk.bf16.vlgmr.msra.gmra.mxu0 %vm300_vm0, %v872_v3  ;;  %632 = vperm.xlu1 %868, %v614_v17   ;;  %v441_v31 = vld [vmem:[#allocation2 + $0x10] sm:$0xff]  ;;  %v439_v33 = vld [vmem:[#allocation2] sm:$0xff] }
  0x16   : > { %817 = vmatprep.mubr.msk.bf16.mxu0 %vm300_vm0, %v873_v4  ;;  %834 = vmatpush3.bf16.msra.mxu0 %v875_v6  ;;  %v442_v37 = vld [vmem:[#allocation2 + $0x18] sm:$0xff]  ;;  %v440_v40 = vld [vmem:[#allocation2 + $0x8] sm:$0xff] }
  0x17   : > { %835 = vmatprep.subr.bf16.mxu0 %v876_v9  ;;  %622 = vperm.xlu0 %867, %v612_v16  }
  0x1a   : > { %836 = vmatpush3.bf16.msra.mxu0 %v876_v9 }
  0x1d   : > { %818 = vmatmul.mubr.msk.bf16.gmra.mxu0 %vm300_vm0, %v874_v5 }
  0x1e   : > { %837 = vmatprep.mubr.msk.bf16.mxu0 %vm300_vm0, %v877_v12 }
  0x25   : > { %838 = vmatmul.mubr.msk.bf16.vlgmr.msra.gmra.mxu0 %vm300_vm0, %v878_v13 }
  0x8c   : > { %v628_v44 = vpop.permute.xlu1 %627 }
  0x8d   : > { %v618_v48 = vpop.permute.xlu0 %617 }
  0x90   : > { %v633_v53 = vpop.permute.xlu1 %632 }
  0x92   : > { %v623_v62 = vpop.permute.xlu0 %622 }
  0xd5   : > { %v815_v18 = vpop.f32.mrf.mxu0 }
  0xd7   : > { %v401_v19 = vpop.f32.mrf.mxu0 }
  0xd9   : > { %v816_v20 = vpop.f32.mrf.mxu0 }
  0xda   : > { %v433_v28 = vpack.c.bf16 %v816_v20, %v815_v18 }
  0xdb   : > { %v404_v21 = vpop.f32.mrf.mxu0 }
  0xdc   : > { %v432_v29 = vpack.c.bf16 %v404_v21, %v401_v19 }
  0xdd   : > { %v819_v22 = vpop.f32.mrf.mxu0 }
  0xdf   : > { %v417_v23 = vpop.f32.mrf.mxu0 }
  0xe1   : > { %v820_v24 = vpop.f32.mrf.mxu0 }
  0xe2   : > { %v435_v25 = vpack.c.bf16 %v820_v24, %v819_v22 }
  0xe3   : > { %v420_v26 = vpop.f32.mrf.mxu0 }
  0xe4   : > { %v434_v27 = vpack.c.bf16 %v420_v26, %v417_v23  ;;  %821 = vmatprep.subr.bf16.mxu1 %v435_v25 }
  0xe5   : > { %822 = vmatpush3.bf16.msra.mxu1 %v435_v25  ;;  %v839_v35 = vpop.f32.mrf.mxu0 }
  0xe6   : > { %823 = vmatprep.subr.bf16.mxu1 %v434_v27  ;;  %v601_v50 = vadd.f32 %v839_v35, %v776_v46 }
  0xe7   : > { %v592_v42 = vpop.f32.mrf.mxu0 }
  0xe8   : > { %v593_v54 = vadd.f32 %v776_v46, %v592_v42 }
  0xe9   : > { %824 = vmatpush3.bf16.msra.mxu1 %v434_v27  ;;  %v840_v47 = vpop.f32.mrf.mxu0 }
  0xea   : > { %825 = vmatprep.subr.bf16.mxu1 %v433_v28  ;;  %v604_v58 = vadd.f32 %v840_v47, %v776_v46 }
  0xeb   : > { %v595_v56 = vpop.f32.mrf.mxu0 }
  0xec   : > { %v596_v1 = vadd.f32 %v776_v46, %v595_v56 }
  0xed   : > { %826 = vmatpush3.bf16.msra.mxu1 %v433_v28 }
  0xee   : > { %827 = vmatprep.subr.bf16.mxu1 %v432_v29 }
  0xf1   : > { %828 = vmatpush3.bf16.msra.mxu1 %v432_v29 }
  0xf4   : > { %830 = vmatmul.mubr.msk.bf16.vlgmr.msra.gmra.mxu1 %vm443_vm1, %v438_v30 }
 0x1b4   : > { %v831_v32 = vpop.f32.mrf.mxu1 }
 0x1b5   : > { %v501_v34 = vadd.f32 %v831_v32, %v441_v31 }
 0x1b6   : > { %v484_v36 = vpop.f32.mrf.mxu1 }
 0x1b7   : > { %505 = vst.msk [vmem:[#allocation2 + $0x10] sm:$0xff] %vm300_vm0, %v501_v34  ;;  %v499_v38 = vadd.f32 %v484_v36, %v439_v33 }
 0x1b8   : > { %v832_v39 = vpop.f32.mrf.mxu1 }
 0x1b9   : > { %503 = vst.msk [vmem:[#allocation2] sm:$0xff] %vm300_vm0, %v499_v38  ;;  %v502_v41 = vadd.f32 %v832_v39, %v442_v37 }
 0x1ba   : > { %v487_v43 = vpop.f32.mrf.mxu1 }
 0x1bb   : > { %506 = vst.msk [vmem:[#allocation2 + $0x18] sm:$0xff] %vm300_vm0, %v502_v41  ;;  %v500_v45 = vadd.f32 %v487_v43, %v440_v40 }
 0x1bd   : > { %504 = vst.msk [vmem:[#allocation2 + $0x8] sm:$0xff] %vm300_vm0, %v500_v45 }
 0x1be   : > { %v609_v49 = vld [vmem:[#allocation2 + $0x10] sm:$0xff] }
 0x1bf   : > { %v637_v52 = vmul.f32 %v628_v44, %v609_v49 }
 0x1c0   : > { %v607_v51 = vld [vmem:[#allocation2] sm:$0xff] }
 0x1c1   : > { %v635_v55 = vmul.f32 %v618_v48, %v607_v51  ;;  %v641_v61 = vadd.f32 %v637_v52, %v601_v50 }
 0x1c2   : > { %v610_v57 = vld [vmem:[#allocation2 + $0x18] sm:$0xff] }
 0x1c3   : > { %v639_v59 = vadd.f32 %v635_v55, %v593_v54  ;;  %v638_v60 = vmul.f32 %v633_v53, %v610_v57  ;;  %v645_v6 = vmax.f32 %v641_v61, 0.0 }
 0x1c4   : > { %v608_v63 = vld [vmem:[#allocation2 + $0x8] sm:$0xff] }
 0x1c5   : > { %v643_v0 = vmax.f32 %v639_v59, 0.0  ;;  %v636_v2 = vmul.f32 %v623_v62, %v608_v63  ;;  %v642_v3 = vadd.f32 %v638_v60, %v604_v58  ;;  %v791_v10 = vpack.c.bf16 %v645_v6, %v645_v6 }
 0x1c7   : > { %v789_v4 = vpack.c.bf16 %v643_v0, %v643_v0  ;;  %v640_v5 = vadd.f32 %v636_v2, %v596_v1  ;;  %v646_v8 = vmax.f32 %v642_v3, 0.0  ;;  %666 = vst.msk [vmem:[%s293_s17 + $0x8] sm:$0xf] %vm663_vm2, %v791_v10 }
 0x1c9   : > { %664 = vst.msk [vmem:[%s293_s17] sm:$0xf] %vm663_vm2, %v789_v4  ;;  %v644_v7 = vmax.f32 %v640_v5, 0.0  ;;  %v792_v11 = vpack.c.bf16 %v646_v8, %v646_v8 }
 0x1cb   : > { %v790_v9 = vpack.c.bf16 %v644_v7, %v644_v7  ;;  %667 = vst.msk [vmem:[%s293_s17 + $0xc] sm:$0xf] %vm663_vm2, %v792_v11 }
 0x1cd   : > { %665 = vst.msk [vmem:[%s293_s17 + $0x4] sm:$0xf] %vm663_vm2, %v790_v9 }
 0x1ce PF: > { %s16_s23 = sadd.s32 1, %s901_s23   ;;  %s1039_s21 = smov %s897_s22 }
 0x1cf   : > { %p13_p6 = scmp.ge.s32.totalorder %s16_s23, 4   ;;  %s1040_s22 = smov %s1042_s24 }
 0x1d1   :  { %15 = sbr.rel (!%p13_p6) target bundleno = 2 (0x2), region = 87 }

</bundles_post_ra>
